<compile_context>
chip_gen: v6e
topology: v6e:2x2x1
jax: 0.10.0
libtpu: 0.0.40
codegen_flags: <defaults>
</compile_context>

<pallas_src>
import functools

import jax
import jax.numpy as jnp
from jax.experimental import pallas as pl
from jax.experimental.pallas import tpu as pltpu

HIDDEN = 32        # hidden_size == input_size (needed for autoregressive feedback)
NUM_CLASSES = 2
OUT_PAD = 128      # lane-dense padded width of the output head


def _chip_has_bf16_eup():
    """bf16 VPU/EUP exists on v6e/v7x; not on v5e and older."""
    kind = jax.devices()[0].device_kind.lower()
    return not any(tag in kind for tag in ("v2", "v3", "v4", "v5"))


def _decoder_rnn_kernel(xh0_ref, c0_ref, w_stack_ref, w_comb_ref, bias_ref,
                        wout_ref, bout_ref, out_ref, hs_ref, *,
                        num_steps, use_bf16):
    H = HIDDEN
    B = c0_ref.shape[0]
    T = num_steps
    gate_dtype = jnp.bfloat16 if use_bf16 else jnp.float32

    # Hoisted once: JAX does not CSE broadcast_in_dim, so doing this in the loop
    # would re-emit a (1,128)->(B,128) sublane broadcast every step.
    bias_b = jnp.broadcast_to(bias_ref[...], (B, 4 * H))
    w_comb = w_comb_ref[...]                    # (H, 4H): W_ih + W_hh, g-cols pre-doubled

    def lstm_combine(gates, c):
        # Single full-width EUP pass (sigmoid only).  The g-gate pre-activation was
        # scaled by 2 in the weights/bias, so tanh(x) = 2*sigmoid(2x) - 1 is one VPU fma.
        sig = jax.nn.sigmoid(gates.astype(gate_dtype)).astype(jnp.float32)
        i_g = sig[:, 0 * H:1 * H]
        f_g = sig[:, 1 * H:2 * H]
        g_g = 2.0 * sig[:, 2 * H:3 * H] - 1.0
        o_g = sig[:, 3 * H:4 * H]
        c_new = f_g * c + i_g * g_g
        h_new = o_g * jnp.tanh(c_new)           # cell-path tanh stays f32 for accuracy
        return h_new, c_new

    # ---- step 0: one fused matmul over the stacked [x0 | h0] input ----
    gates = jnp.dot(xh0_ref[...], w_stack_ref[...],
                    preferred_element_type=jnp.float32) + bias_b
    h, c = lstm_combine(gates, c0_ref[...])
    hs_ref[0:B, :] = h

    # ---- steps 1..T-1: fed-back input equals h -> single merged matmul ----
    # Statically unrolled; h/c stay in vregs across the whole recurrence.
    for t in range(1, T):
        gates = jnp.dot(h, w_comb, preferred_element_type=jnp.float32) + bias_b
        h, c = lstm_combine(gates, c)
        hs_ref[t * B:(t + 1) * B, :] = h

    # ---- deferred output head: one (T*B,H)@(H,128) matmul, then batch-major,
    # fully aligned (8,128) lane-dense stores (no wrapper transpose needed). ----
    logits = (jnp.dot(hs_ref[...], wout_ref[...],
                      preferred_element_type=jnp.float32) + bout_ref[...])
    logits = logits.astype(out_ref.dtype)
    for t in range(T):
        out_ref[:, t * OUT_PAD:(t + 1) * OUT_PAD] = logits[t * B:(t + 1) * B, :]


def prepare_params(w_ih_t, w_hh_t, b_ih, b_hh, w_out_t, b_out):
    """One-time, out-of-the-hot-path prep of kernel-ready constants."""
    H = w_hh_t.shape[0]
    C = w_out_t.shape[1]
    # Fold tanh(x)=2*sigmoid(2x)-1 rescaling into the g-gate (cell candidate) columns.
    gscale = jnp.ones((1, 4 * H), jnp.float32).at[:, 2 * H:3 * H].set(2.0)
    w_stack = jnp.concatenate([w_ih_t, w_hh_t], axis=0) * gscale   # (2H, 4H), step-0 fused
    w_comb = (w_ih_t + w_hh_t) * gscale                            # (H, 4H), valid: x==h for t>=1
    bias = ((b_ih + b_hh)[None, :]) * gscale                       # (1, 4H)
    # Lane-dense output head: pad Linear(H->C) to 128 lanes; wrapper slices [:, :, :C].
    w_out_pad = jnp.zeros((H, OUT_PAD), jnp.float32).at[:, :C].set(w_out_t)
    b_out_pad = jnp.zeros((1, OUT_PAD), jnp.float32).at[:, :C].set(b_out)
    return dict(w_stack=w_stack, w_comb=w_comb, bias=bias,
                w_out=w_out_pad, b_out=b_out_pad)


@functools.partial(jax.jit, static_argnames=("num_steps", "num_classes", "use_bf16"))
def decoder_rnn_forward(params, x0, h0, c0, num_steps, num_classes, use_bf16):
    B, H = h0.shape
    xh0 = jnp.concatenate([x0, h0], axis=1)    # (B, 2H) for the fused step-0 matmul

    kernel = functools.partial(_decoder_rnn_kernel,
                               num_steps=num_steps, use_bf16=use_bf16)
    vmem = pl.BlockSpec(memory_space=pltpu.MemorySpace.VMEM)

    out_flat = pl.pallas_call(
        kernel,
        out_shape=jax.ShapeDtypeStruct((B, num_steps * OUT_PAD), jnp.float32),
        in_specs=[vmem] * 7,                   # tiny operands: whole arrays in VMEM
        out_specs=vmem,
        scratch_shapes=[pltpu.VMEM((num_steps * B, H), jnp.float32)],  # h history
    )(xh0, c0, params["w_stack"], params["w_comb"], params["bias"],
      params["w_out"], params["b_out"])

    # (B, T*128) is already batch-major: reshape is free, slice keeps the real classes.
    return out_flat.reshape(B, num_steps, OUT_PAD)[:, :, :num_classes]


def reference_forward(x0, h0, c0, w_ih_t, w_hh_t, bias, w_out_t, b_out, T):
    """Pure-JAX reference of the same decode loop (lax.scan), f32/HIGHEST precision."""
    H = h0.shape[1]
    hi = jax.lax.Precision.HIGHEST

    def step(carry, _):
        x, h, c = carry
        gates = (jnp.dot(x, w_ih_t, precision=hi)
                 + jnp.dot(h, w_hh_t, precision=hi) + bias[0])
        i_g = jax.nn.sigmoid(gates[:, 0 * H:1 * H])
        f_g = jax.nn.sigmoid(gates[:, 1 * H:2 * H])
        g_g = jnp.tanh(gates[:, 2 * H:3 * H])
        o_g = jax.nn.sigmoid(gates[:, 3 * H:4 * H])
        c_n = f_g * c + i_g * g_g
        h_n = o_g * jnp.tanh(c_n)
        logits = jnp.dot(h_n, w_out_t, precision=hi) + b_out[0]
        return (h_n, h_n, c_n), logits

    _, ys = jax.lax.scan(step, (x0, h0, c0), None, length=T)
    return jnp.transpose(ys, (1, 0, 2))


if __name__ == "__main__":
    B = 8                 # batch_size
    H = HIDDEN            # hidden_size == input_size
    I = HIDDEN
    C = NUM_CLASSES
    T = B                 # reference forward loops `for b in range(batch_size)`

    key = jax.random.PRNGKey(0)
    ks = jax.random.split(key, 8)
    scale = 1.0 / jnp.sqrt(jnp.float32(H))

    # nn.LSTM(input_size, hidden_size) params, stored transposed for (B,K)@(K,N)
    w_ih_t = jax.random.uniform(ks[0], (I, 4 * H), jnp.float32, -scale, scale)
    w_hh_t = jax.random.uniform(ks[1], (H, 4 * H), jnp.float32, -scale, scale)
    b_ih = jax.random.uniform(ks[2], (4 * H,), jnp.float32, -scale, scale)
    b_hh = jax.random.uniform(ks[3], (4 * H,), jnp.float32, -scale, scale)

    # out_layer = nn.Linear(hidden_size, num_classes=2)
    w_out_t = jax.random.uniform(ks[4], (H, C), jnp.float32, -scale, scale)
    b_out = jax.random.uniform(ks[5], (C,), jnp.float32, -scale, scale)[None, :]

    # start_token: (seq_len=1, batch, input) -> squeezed to (B, I)
    x0 = jax.random.normal(ks[6], (B, I), dtype=jnp.float32)
    # input_state = (h0, c0), each (num_layers*num_directions=1, B, H) -> (B, H)
    h0 = 0.1 * jax.random.normal(ks[7], (B, H), dtype=jnp.float32)
    c0 = jnp.zeros((B, H), dtype=jnp.float32)

    lengths = jnp.full((B,), T, dtype=jnp.int32)
    # TODO(synk): reference forward never uses `lengths` meaningfully (it indexes an
    # undefined variable); kept here only for call-signature parity.

    use_bf16 = _chip_has_bf16_eup()                 # bf16 EUP path only on v6e/v7x
    params = prepare_params(w_ih_t, w_hh_t, b_ih, b_hh, w_out_t, b_out)  # one-time prep

    probs = decoder_rnn_forward(params, x0, h0, c0, T, C, use_bf16)
    probs = jax.block_until_ready(probs)

    bias = (b_ih + b_hh)[None, :]
    ref = reference_forward(x0, h0, c0, w_ih_t, w_hh_t, bias, w_out_t, b_out, T)
    assert probs.shape == (B, T, C), probs.shape

    # f32 path: tight enough to catch algebra/gate-order regressions while leaving
    # headroom for MXU f32 pass-count differences vs. the HIGHEST-precision reference.
    # bf16 path (v6e/v7x): transcendentals intentionally run in bf16 -> looser bound.
    tol = 2e-2 if use_bf16 else 1e-2
    err = float(jnp.max(jnp.abs(probs - ref)))
    assert jnp.allclose(probs, ref, atol=tol, rtol=tol), err
    print("KERNEL_OK")
</pallas_src>

<mosaic_0001>
module attributes {stable_mosaic.version = 11 : i64} {
  func.func @_decoder_rnn_kernel(%arg0: memref<8x64xf32, #tpu.memory_space<vmem>>, %arg1: memref<8x32xf32, #tpu.memory_space<vmem>>, %arg2: memref<64x128xf32, #tpu.memory_space<vmem>>, %arg3: memref<32x128xf32, #tpu.memory_space<vmem>>, %arg4: memref<1x128xf32, #tpu.memory_space<vmem>>, %arg5: memref<32x128xf32, #tpu.memory_space<vmem>>, %arg6: memref<1x128xf32, #tpu.memory_space<vmem>>, %arg7: memref<8x1024xf32, #tpu.memory_space<vmem>>, %arg8: memref<64x32xf32, #tpu.memory_space<vmem>>) attributes {dimension_semantics = [], scalar_prefetch = 0 : i64, scratch_operands = 1 : i64, tpu.core_type = #tpu.core_type<tc>} {
    %c0 = arith.constant 0 : index
    %c0_0 = arith.constant 0 : index
    %0 = vector.load %arg4[%c0, %c0_0] : memref<1x128xf32, #tpu.memory_space<vmem>>, vector<1x128xf32>
    %1 = vector.shape_cast %0 : vector<1x128xf32> to vector<1x128xf32>
    %2 = vector.broadcast %1 : vector<1x128xf32> to vector<8x128xf32>
    %c0_1 = arith.constant 0 : index
    %c0_2 = arith.constant 0 : index
    %3 = vector.load %arg3[%c0_1, %c0_2] : memref<32x128xf32, #tpu.memory_space<vmem>>, vector<32x128xf32>
    %c0_3 = arith.constant 0 : index
    %c0_4 = arith.constant 0 : index
    %4 = vector.load %arg0[%c0_3, %c0_4] : memref<8x64xf32, #tpu.memory_space<vmem>>, vector<8x64xf32>
    %c0_5 = arith.constant 0 : index
    %c0_6 = arith.constant 0 : index
    %5 = vector.load %arg2[%c0_5, %c0_6] : memref<64x128xf32, #tpu.memory_space<vmem>>, vector<64x128xf32>
    %cst = arith.constant dense<0.000000e+00> : vector<8x128xf32>
    %6 = tpu.matmul %4, %5, %cst {dimension_numbers = #tpu.dot_dimension_numbers<[1], [0], [0], [1], [0, 0, 1, 1], [], []>} : vector<8x64xf32>, vector<64x128xf32>, vector<8x128xf32> -> vector<8x128xf32>
    %7 = arith.addf %6, %2 : vector<8x128xf32>
    %c0_7 = arith.constant 0 : index
    %c0_8 = arith.constant 0 : index
    %8 = vector.load %arg1[%c0_7, %c0_8] : memref<8x32xf32, #tpu.memory_space<vmem>>, vector<8x32xf32>
    %9 = arith.truncf %7 : vector<8x128xf32> to vector<8x128xbf16>
    %10 = arith.negf %9 : vector<8x128xbf16>
    %11 = math.exp %10 : vector<8x128xbf16>
    %cst_9 = arith.constant 1.000000e+00 : bf16
    %12 = vector.broadcast %cst_9 : bf16 to vector<8x128xbf16>
    %13 = arith.addf %12, %11 : vector<8x128xbf16>
    %14 = arith.divf %12, %13 : vector<8x128xbf16>
    %15 = arith.extf %14 : vector<8x128xbf16> to vector<8x128xf32>
    %16 = vector.extract_strided_slice %15 {offsets = [0, 0], sizes = [8, 32], strides = [1, 1]} : vector<8x128xf32> to vector<8x32xf32>
    %17 = vector.extract_strided_slice %15 {offsets = [0, 32], sizes = [8, 32], strides = [1, 1]} : vector<8x128xf32> to vector<8x32xf32>
    %18 = vector.extract_strided_slice %15 {offsets = [0, 64], sizes = [8, 32], strides = [1, 1]} : vector<8x128xf32> to vector<8x32xf32>
    %cst_10 = arith.constant 2.000000e+00 : f32
    %19 = vector.broadcast %cst_10 : f32 to vector<8x32xf32>
    %20 = arith.mulf %19, %18 : vector<8x32xf32>
    %cst_11 = arith.constant 1.000000e+00 : f32
    %21 = vector.broadcast %cst_11 : f32 to vector<8x32xf32>
    %22 = arith.subf %20, %21 : vector<8x32xf32>
    %23 = vector.extract_strided_slice %15 {offsets = [0, 96], sizes = [8, 32], strides = [1, 1]} : vector<8x128xf32> to vector<8x32xf32>
    %24 = arith.mulf %17, %8 : vector<8x32xf32>
    %25 = arith.mulf %16, %22 : vector<8x32xf32>
    %26 = arith.addf %24, %25 : vector<8x32xf32>
    %27 = math.tanh %26 : vector<8x32xf32>
    %28 = arith.mulf %23, %27 : vector<8x32xf32>
    %c0_12 = arith.constant 0 : index
    %c0_13 = arith.constant 0 : index
    %29 = vector.load %arg8[%c0_12, %c0_13] : memref<64x32xf32, #tpu.memory_space<vmem>>, vector<8x32xf32>
    tpu.vector_store %arg8[%c0_12, %c0_13], %28 {strides = array<i32>} : memref<64x32xf32, #tpu.memory_space<vmem>>, vector<8x32xf32>,
    %cst_14 = arith.constant dense<0.000000e+00> : vector<8x128xf32>
    %30 = tpu.matmul %28, %3, %cst_14 {dimension_numbers = #tpu.dot_dimension_numbers<[1], [0], [0], [1], [0, 0, 1, 1], [], []>} : vector<8x32xf32>, vector<32x128xf32>, vector<8x128xf32> -> vector<8x128xf32>
    %31 = arith.addf %30, %2 : vector<8x128xf32>
    %32 = arith.truncf %31 : vector<8x128xf32> to vector<8x128xbf16>
    %33 = arith.negf %32 : vector<8x128xbf16>
    %34 = math.exp %33 : vector<8x128xbf16>
    %cst_15 = arith.constant 1.000000e+00 : bf16
    %35 = vector.broadcast %cst_15 : bf16 to vector<8x128xbf16>
    %36 = arith.addf %35, %34 : vector<8x128xbf16>
    %37 = arith.divf %35, %36 : vector<8x128xbf16>
    %38 = arith.extf %37 : vector<8x128xbf16> to vector<8x128xf32>
    %39 = vector.extract_strided_slice %38 {offsets = [0, 0], sizes = [8, 32], strides = [1, 1]} : vector<8x128xf32> to vector<8x32xf32>
    %40 = vector.extract_strided_slice %38 {offsets = [0, 32], sizes = [8, 32], strides = [1, 1]} : vector<8x128xf32> to vector<8x32xf32>
    %41 = vector.extract_strided_slice %38 {offsets = [0, 64], sizes = [8, 32], strides = [1, 1]} : vector<8x128xf32> to vector<8x32xf32>
    %cst_16 = arith.constant 2.000000e+00 : f32
    %42 = vector.broadcast %cst_16 : f32 to vector<8x32xf32>
    %43 = arith.mulf %42, %41 : vector<8x32xf32>
    %cst_17 = arith.constant 1.000000e+00 : f32
    %44 = vector.broadcast %cst_17 : f32 to vector<8x32xf32>
    %45 = arith.subf %43, %44 : vector<8x32xf32>
    %46 = vector.extract_strided_slice %38 {offsets = [0, 96], sizes = [8, 32], strides = [1, 1]} : vector<8x128xf32> to vector<8x32xf32>
    %47 = arith.mulf %40, %26 : vector<8x32xf32>
    %48 = arith.mulf %39, %45 : vector<8x32xf32>
    %49 = arith.addf %47, %48 : vector<8x32xf32>
    %50 = math.tanh %49 : vector<8x32xf32>
    %51 = arith.mulf %46, %50 : vector<8x32xf32>
    %c8 = arith.constant 8 : index
    %c0_18 = arith.constant 0 : index
    %52 = vector.load %arg8[%c8, %c0_18] : memref<64x32xf32, #tpu.memory_space<vmem>>, vector<8x32xf32>
    tpu.vector_store %arg8[%c8, %c0_18], %51 {strides = array<i32>} : memref<64x32xf32, #tpu.memory_space<vmem>>, vector<8x32xf32>,
    %cst_19 = arith.constant dense<0.000000e+00> : vector<8x128xf32>
    %53 = tpu.matmul %51, %3, %cst_19 {dimension_numbers = #tpu.dot_dimension_numbers<[1], [0], [0], [1], [0, 0, 1, 1], [], []>} : vector<8x32xf32>, vector<32x128xf32>, vector<8x128xf32> -> vector<8x128xf32>
    %54 = arith.addf %53, %2 : vector<8x128xf32>
    %55 = arith.truncf %54 : vector<8x128xf32> to vector<8x128xbf16>
    %56 = arith.negf %55 : vector<8x128xbf16>
    %57 = math.exp %56 : vector<8x128xbf16>
    %cst_20 = arith.constant 1.000000e+00 : bf16
    %58 = vector.broadcast %cst_20 : bf16 to vector<8x128xbf16>
    %59 = arith.addf %58, %57 : vector<8x128xbf16>
    %60 = arith.divf %58, %59 : vector<8x128xbf16>
    %61 = arith.extf %60 : vector<8x128xbf16> to vector<8x128xf32>
    %62 = vector.extract_strided_slice %61 {offsets = [0, 0], sizes = [8, 32], strides = [1, 1]} : vector<8x128xf32> to vector<8x32xf32>
    %63 = vector.extract_strided_slice %61 {offsets = [0, 32], sizes = [8, 32], strides = [1, 1]} : vector<8x128xf32> to vector<8x32xf32>
    %64 = vector.extract_strided_slice %61 {offsets = [0, 64], sizes = [8, 32], strides = [1, 1]} : vector<8x128xf32> to vector<8x32xf32>
    %cst_21 = arith.constant 2.000000e+00 : f32
    %65 = vector.broadcast %cst_21 : f32 to vector<8x32xf32>
    %66 = arith.mulf %65, %64 : vector<8x32xf32>
    %cst_22 = arith.constant 1.000000e+00 : f32
    %67 = vector.broadcast %cst_22 : f32 to vector<8x32xf32>
    %68 = arith.subf %66, %67 : vector<8x32xf32>
    %69 = vector.extract_strided_slice %61 {offsets = [0, 96], sizes = [8, 32], strides = [1, 1]} : vector<8x128xf32> to vector<8x32xf32>
    %70 = arith.mulf %63, %49 : vector<8x32xf32>
    %71 = arith.mulf %62, %68 : vector<8x32xf32>
    %72 = arith.addf %70, %71 : vector<8x32xf32>
    %73 = math.tanh %72 : vector<8x32xf32>
    %74 = arith.mulf %69, %73 : vector<8x32xf32>
    %c16 = arith.constant 16 : index
    %c0_23 = arith.constant 0 : index
    %75 = vector.load %arg8[%c16, %c0_23] : memref<64x32xf32, #tpu.memory_space<vmem>>, vector<8x32xf32>
    tpu.vector_store %arg8[%c16, %c0_23], %74 {strides = array<i32>} : memref<64x32xf32, #tpu.memory_space<vmem>>, vector<8x32xf32>,
    %cst_24 = arith.constant dense<0.000000e+00> : vector<8x128xf32>
    %76 = tpu.matmul %74, %3, %cst_24 {dimension_numbers = #tpu.dot_dimension_numbers<[1], [0], [0], [1], [0, 0, 1, 1], [], []>} : vector<8x32xf32>, vector<32x128xf32>, vector<8x128xf32> -> vector<8x128xf32>
    %77 = arith.addf %76, %2 : vector<8x128xf32>
    %78 = arith.truncf %77 : vector<8x128xf32> to vector<8x128xbf16>
    %79 = arith.negf %78 : vector<8x128xbf16>
    %80 = math.exp %79 : vector<8x128xbf16>
    %cst_25 = arith.constant 1.000000e+00 : bf16
    %81 = vector.broadcast %cst_25 : bf16 to vector<8x128xbf16>
    %82 = arith.addf %81, %80 : vector<8x128xbf16>
    %83 = arith.divf %81, %82 : vector<8x128xbf16>
    %84 = arith.extf %83 : vector<8x128xbf16> to vector<8x128xf32>
    %85 = vector.extract_strided_slice %84 {offsets = [0, 0], sizes = [8, 32], strides = [1, 1]} : vector<8x128xf32> to vector<8x32xf32>
    %86 = vector.extract_strided_slice %84 {offsets = [0, 32], sizes = [8, 32], strides = [1, 1]} : vector<8x128xf32> to vector<8x32xf32>
    %87 = vector.extract_strided_slice %84 {offsets = [0, 64], sizes = [8, 32], strides = [1, 1]} : vector<8x128xf32> to vector<8x32xf32>
    %cst_26 = arith.constant 2.000000e+00 : f32
    %88 = vector.broadcast %cst_26 : f32 to vector<8x32xf32>
    %89 = arith.mulf %88, %87 : vector<8x32xf32>
    %cst_27 = arith.constant 1.000000e+00 : f32
    %90 = vector.broadcast %cst_27 : f32 to vector<8x32xf32>
    %91 = arith.subf %89, %90 : vector<8x32xf32>
    %92 = vector.extract_strided_slice %84 {offsets = [0, 96], sizes = [8, 32], strides = [1, 1]} : vector<8x128xf32> to vector<8x32xf32>
    %93 = arith.mulf %86, %72 : vector<8x32xf32>
    %94 = arith.mulf %85, %91 : vector<8x32xf32>
    %95 = arith.addf %93, %94 : vector<8x32xf32>
    %96 = math.tanh %95 : vector<8x32xf32>
    %97 = arith.mulf %92, %96 : vector<8x32xf32>
    %c24 = arith.constant 24 : index
    %c0_28 = arith.constant 0 : index
    %98 = vector.load %arg8[%c24, %c0_28] : memref<64x32xf32, #tpu.memory_space<vmem>>, vector<8x32xf32>
    tpu.vector_store %arg8[%c24, %c0_28], %97 {strides = array<i32>} : memref<64x32xf32, #tpu.memory_space<vmem>>, vector<8x32xf32>,
    %cst_29 = arith.constant dense<0.000000e+00> : vector<8x128xf32>
    %99 = tpu.matmul %97, %3, %cst_29 {dimension_numbers = #tpu.dot_dimension_numbers<[1], [0], [0], [1], [0, 0, 1, 1], [], []>} : vector<8x32xf32>, vector<32x128xf32>, vector<8x128xf32> -> vector<8x128xf32>
    %100 = arith.addf %99, %2 : vector<8x128xf32>
    %101 = arith.truncf %100 : vector<8x128xf32> to vector<8x128xbf16>
    %102 = arith.negf %101 : vector<8x128xbf16>
    %103 = math.exp %102 : vector<8x128xbf16>
    %cst_30 = arith.constant 1.000000e+00 : bf16
    %104 = vector.broadcast %cst_30 : bf16 to vector<8x128xbf16>
    %105 = arith.addf %104, %103 : vector<8x128xbf16>
    %106 = arith.divf %104, %105 : vector<8x128xbf16>
    %107 = arith.extf %106 : vector<8x128xbf16> to vector<8x128xf32>
    %108 = vector.extract_strided_slice %107 {offsets = [0, 0], sizes = [8, 32], strides = [1, 1]} : vector<8x128xf32> to vector<8x32xf32>
    %109 = vector.extract_strided_slice %107 {offsets = [0, 32], sizes = [8, 32], strides = [1, 1]} : vector<8x128xf32> to vector<8x32xf32>
    %110 = vector.extract_strided_slice %107 {offsets = [0, 64], sizes = [8, 32], strides = [1, 1]} : vector<8x128xf32> to vector<8x32xf32>
    %cst_31 = arith.constant 2.000000e+00 : f32
    %111 = vector.broadcast %cst_31 : f32 to vector<8x32xf32>
    %112 = arith.mulf %111, %110 : vector<8x32xf32>
    %cst_32 = arith.constant 1.000000e+00 : f32
    %113 = vector.broadcast %cst_32 : f32 to vector<8x32xf32>
    %114 = arith.subf %112, %113 : vector<8x32xf32>
    %115 = vector.extract_strided_slice %107 {offsets = [0, 96], sizes = [8, 32], strides = [1, 1]} : vector<8x128xf32> to vector<8x32xf32>
    %116 = arith.mulf %109, %95 : vector<8x32xf32>
    %117 = arith.mulf %108, %114 : vector<8x32xf32>
    %118 = arith.addf %116, %117 : vector<8x32xf32>
    %119 = math.tanh %118 : vector<8x32xf32>
    %120 = arith.mulf %115, %119 : vector<8x32xf32>
    %c32 = arith.constant 32 : index
    %c0_33 = arith.constant 0 : index
    %121 = vector.load %arg8[%c32, %c0_33] : memref<64x32xf32, #tpu.memory_space<vmem>>, vector<8x32xf32>
    tpu.vector_store %arg8[%c32, %c0_33], %120 {strides = array<i32>} : memref<64x32xf32, #tpu.memory_space<vmem>>, vector<8x32xf32>,
    %cst_34 = arith.constant dense<0.000000e+00> : vector<8x128xf32>
    %122 = tpu.matmul %120, %3, %cst_34 {dimension_numbers = #tpu.dot_dimension_numbers<[1], [0], [0], [1], [0, 0, 1, 1], [], []>} : vector<8x32xf32>, vector<32x128xf32>, vector<8x128xf32> -> vector<8x128xf32>
    %123 = arith.addf %122, %2 : vector<8x128xf32>
    %124 = arith.truncf %123 : vector<8x128xf32> to vector<8x128xbf16>
    %125 = arith.negf %124 : vector<8x128xbf16>
    %126 = math.exp %125 : vector<8x128xbf16>
    %cst_35 = arith.constant 1.000000e+00 : bf16
    %127 = vector.broadcast %cst_35 : bf16 to vector<8x128xbf16>
    %128 = arith.addf %127, %126 : vector<8x128xbf16>
    %129 = arith.divf %127, %128 : vector<8x128xbf16>
    %130 = arith.extf %129 : vector<8x128xbf16> to vector<8x128xf32>
    %131 = vector.extract_strided_slice %130 {offsets = [0, 0], sizes = [8, 32], strides = [1, 1]} : vector<8x128xf32> to vector<8x32xf32>
    %132 = vector.extract_strided_slice %130 {offsets = [0, 32], sizes = [8, 32], strides = [1, 1]} : vector<8x128xf32> to vector<8x32xf32>
    %133 = vector.extract_strided_slice %130 {offsets = [0, 64], sizes = [8, 32], strides = [1, 1]} : vector<8x128xf32> to vector<8x32xf32>
    %cst_36 = arith.constant 2.000000e+00 : f32
    %134 = vector.broadcast %cst_36 : f32 to vector<8x32xf32>
    %135 = arith.mulf %134, %133 : vector<8x32xf32>
    %cst_37 = arith.constant 1.000000e+00 : f32
    %136 = vector.broadcast %cst_37 : f32 to vector<8x32xf32>
    %137 = arith.subf %135, %136 : vector<8x32xf32>
    %138 = vector.extract_strided_slice %130 {offsets = [0, 96], sizes = [8, 32], strides = [1, 1]} : vector<8x128xf32> to vector<8x32xf32>
    %139 = arith.mulf %132, %118 : vector<8x32xf32>
    %140 = arith.mulf %131, %137 : vector<8x32xf32>
    %141 = arith.addf %139, %140 : vector<8x32xf32>
    %142 = math.tanh %141 : vector<8x32xf32>
    %143 = arith.mulf %138, %142 : vector<8x32xf32>
    %c40 = arith.constant 40 : index
    %c0_38 = arith.constant 0 : index
    %144 = vector.load %arg8[%c40, %c0_38] : memref<64x32xf32, #tpu.memory_space<vmem>>, vector<8x32xf32>
    tpu.vector_store %arg8[%c40, %c0_38], %143 {strides = array<i32>} : memref<64x32xf32, #tpu.memory_space<vmem>>, vector<8x32xf32>,
    %cst_39 = arith.constant dense<0.000000e+00> : vector<8x128xf32>
    %145 = tpu.matmul %143, %3, %cst_39 {dimension_numbers = #tpu.dot_dimension_numbers<[1], [0], [0], [1], [0, 0, 1, 1], [], []>} : vector<8x32xf32>, vector<32x128xf32>, vector<8x128xf32> -> vector<8x128xf32>
    %146 = arith.addf %145, %2 : vector<8x128xf32>
    %147 = arith.truncf %146 : vector<8x128xf32> to vector<8x128xbf16>
    %148 = arith.negf %147 : vector<8x128xbf16>
    %149 = math.exp %148 : vector<8x128xbf16>
    %cst_40 = arith.constant 1.000000e+00 : bf16
    %150 = vector.broadcast %cst_40 : bf16 to vector<8x128xbf16>
    %151 = arith.addf %150, %149 : vector<8x128xbf16>
    %152 = arith.divf %150, %151 : vector<8x128xbf16>
    %153 = arith.extf %152 : vector<8x128xbf16> to vector<8x128xf32>
    %154 = vector.extract_strided_slice %153 {offsets = [0, 0], sizes = [8, 32], strides = [1, 1]} : vector<8x128xf32> to vector<8x32xf32>
    %155 = vector.extract_strided_slice %153 {offsets = [0, 32], sizes = [8, 32], strides = [1, 1]} : vector<8x128xf32> to vector<8x32xf32>
    %156 = vector.extract_strided_slice %153 {offsets = [0, 64], sizes = [8, 32], strides = [1, 1]} : vector<8x128xf32> to vector<8x32xf32>
    %cst_41 = arith.constant 2.000000e+00 : f32
    %157 = vector.broadcast %cst_41 : f32 to vector<8x32xf32>
    %158 = arith.mulf %157, %156 : vector<8x32xf32>
    %cst_42 = arith.constant 1.000000e+00 : f32
    %159 = vector.broadcast %cst_42 : f32 to vector<8x32xf32>
    %160 = arith.subf %158, %159 : vector<8x32xf32>
    %161 = vector.extract_strided_slice %153 {offsets = [0, 96], sizes = [8, 32], strides = [1, 1]} : vector<8x128xf32> to vector<8x32xf32>
    %162 = arith.mulf %155, %141 : vector<8x32xf32>
    %163 = arith.mulf %154, %160 : vector<8x32xf32>
    %164 = arith.addf %162, %163 : vector<8x32xf32>
    %165 = math.tanh %164 : vector<8x32xf32>
    %166 = arith.mulf %161, %165 : vector<8x32xf32>
    %c48 = arith.constant 48 : index
    %c0_43 = arith.constant 0 : index
    %167 = vector.load %arg8[%c48, %c0_43] : memref<64x32xf32, #tpu.memory_space<vmem>>, vector<8x32xf32>
    tpu.vector_store %arg8[%c48, %c0_43], %166 {strides = array<i32>} : memref<64x32xf32, #tpu.memory_space<vmem>>, vector<8x32xf32>,
    %cst_44 = arith.constant dense<0.000000e+00> : vector<8x128xf32>
    %168 = tpu.matmul %166, %3, %cst_44 {dimension_numbers = #tpu.dot_dimension_numbers<[1], [0], [0], [1], [0, 0, 1, 1], [], []>} : vector<8x32xf32>, vector<32x128xf32>, vector<8x128xf32> -> vector<8x128xf32>
    %169 = arith.addf %168, %2 : vector<8x128xf32>
    %170 = arith.truncf %169 : vector<8x128xf32> to vector<8x128xbf16>
    %171 = arith.negf %170 : vector<8x128xbf16>
    %172 = math.exp %171 : vector<8x128xbf16>
    %cst_45 = arith.constant 1.000000e+00 : bf16
    %173 = vector.broadcast %cst_45 : bf16 to vector<8x128xbf16>
    %174 = arith.addf %173, %172 : vector<8x128xbf16>
    %175 = arith.divf %173, %174 : vector<8x128xbf16>
    %176 = arith.extf %175 : vector<8x128xbf16> to vector<8x128xf32>
    %177 = vector.extract_strided_slice %176 {offsets = [0, 0], sizes = [8, 32], strides = [1, 1]} : vector<8x128xf32> to vector<8x32xf32>
    %178 = vector.extract_strided_slice %176 {offsets = [0, 32], sizes = [8, 32], strides = [1, 1]} : vector<8x128xf32> to vector<8x32xf32>
    %179 = vector.extract_strided_slice %176 {offsets = [0, 64], sizes = [8, 32], strides = [1, 1]} : vector<8x128xf32> to vector<8x32xf32>
    %cst_46 = arith.constant 2.000000e+00 : f32
    %180 = vector.broadcast %cst_46 : f32 to vector<8x32xf32>
    %181 = arith.mulf %180, %179 : vector<8x32xf32>
    %cst_47 = arith.constant 1.000000e+00 : f32
    %182 = vector.broadcast %cst_47 : f32 to vector<8x32xf32>
    %183 = arith.subf %181, %182 : vector<8x32xf32>
    %184 = vector.extract_strided_slice %176 {offsets = [0, 96], sizes = [8, 32], strides = [1, 1]} : vector<8x128xf32> to vector<8x32xf32>
    %185 = arith.mulf %178, %164 : vector<8x32xf32>
    %186 = arith.mulf %177, %183 : vector<8x32xf32>
    %187 = arith.addf %185, %186 : vector<8x32xf32>
    %188 = math.tanh %187 : vector<8x32xf32>
    %189 = arith.mulf %184, %188 : vector<8x32xf32>
    %c56 = arith.constant 56 : index
    %c0_48 = arith.constant 0 : index
    %190 = vector.load %arg8[%c56, %c0_48] : memref<64x32xf32, #tpu.memory_space<vmem>>, vector<8x32xf32>
    tpu.vector_store %arg8[%c56, %c0_48], %189 {strides = array<i32>} : memref<64x32xf32, #tpu.memory_space<vmem>>, vector<8x32xf32>,
    %c0_49 = arith.constant 0 : index
    %c0_50 = arith.constant 0 : index
    %191 = vector.load %arg8[%c0_49, %c0_50] : memref<64x32xf32, #tpu.memory_space<vmem>>, vector<64x32xf32>
    %c0_51 = arith.constant 0 : index
    %c0_52 = arith.constant 0 : index
    %192 = vector.load %arg5[%c0_51, %c0_52] : memref<32x128xf32, #tpu.memory_space<vmem>>, vector<32x128xf32>
    %cst_53 = arith.constant dense<0.000000e+00> : vector<64x128xf32>
    %193 = tpu.matmul %191, %192, %cst_53 {dimension_numbers = #tpu.dot_dimension_numbers<[1], [0], [0], [1], [0, 0, 1, 1], [], []>} : vector<64x32xf32>, vector<32x128xf32>, vector<64x128xf32> -> vector<64x128xf32>
    %c0_54 = arith.constant 0 : index
    %c0_55 = arith.constant 0 : index
    %194 = vector.load %arg6[%c0_54, %c0_55] : memref<1x128xf32, #tpu.memory_space<vmem>>, vector<1x128xf32>
    %195 = vector.broadcast %194 : vector<1x128xf32> to vector<64x128xf32>
    %196 = arith.addf %193, %195 : vector<64x128xf32>
    %197 = vector.extract_strided_slice %196 {offsets = [0, 0], sizes = [8, 128], strides = [1, 1]} : vector<64x128xf32> to vector<8x128xf32>
    %c0_56 = arith.constant 0 : index
    %c0_57 = arith.constant 0 : index
    %198 = vector.load %arg7[%c0_56, %c0_57] : memref<8x1024xf32, #tpu.memory_space<vmem>>, vector<8x128xf32>
    tpu.vector_store %arg7[%c0_56, %c0_57], %197 {strides = array<i32>} : memref<8x1024xf32, #tpu.memory_space<vmem>>, vector<8x128xf32>,
    %199 = vector.extract_strided_slice %196 {offsets = [8, 0], sizes = [8, 128], strides = [1, 1]} : vector<64x128xf32> to vector<8x128xf32>
    %c0_58 = arith.constant 0 : index
    %c128 = arith.constant 128 : index
    %200 = vector.load %arg7[%c0_58, %c128] : memref<8x1024xf32, #tpu.memory_space<vmem>>, vector<8x128xf32>
    tpu.vector_store %arg7[%c0_58, %c128], %199 {strides = array<i32>} : memref<8x1024xf32, #tpu.memory_space<vmem>>, vector<8x128xf32>,
    %201 = vector.extract_strided_slice %196 {offsets = [16, 0], sizes = [8, 128], strides = [1, 1]} : vector<64x128xf32> to vector<8x128xf32>
    %c0_59 = arith.constant 0 : index
    %c256 = arith.constant 256 : index
    %202 = vector.load %arg7[%c0_59, %c256] : memref<8x1024xf32, #tpu.memory_space<vmem>>, vector<8x128xf32>
    tpu.vector_store %arg7[%c0_59, %c256], %201 {strides = array<i32>} : memref<8x1024xf32, #tpu.memory_space<vmem>>, vector<8x128xf32>,
    %203 = vector.extract_strided_slice %196 {offsets = [24, 0], sizes = [8, 128], strides = [1, 1]} : vector<64x128xf32> to vector<8x128xf32>
    %c0_60 = arith.constant 0 : index
    %c384 = arith.constant 384 : index
    %204 = vector.load %arg7[%c0_60, %c384] : memref<8x1024xf32, #tpu.memory_space<vmem>>, vector<8x128xf32>
    tpu.vector_store %arg7[%c0_60, %c384], %203 {strides = array<i32>} : memref<8x1024xf32, #tpu.memory_space<vmem>>, vector<8x128xf32>,
    %205 = vector.extract_strided_slice %196 {offsets = [32, 0], sizes = [8, 128], strides = [1, 1]} : vector<64x128xf32> to vector<8x128xf32>
    %c0_61 = arith.constant 0 : index
    %c512 = arith.constant 512 : index
    %206 = vector.load %arg7[%c0_61, %c512] : memref<8x1024xf32, #tpu.memory_space<vmem>>, vector<8x128xf32>
    tpu.vector_store %arg7[%c0_61, %c512], %205 {strides = array<i32>} : memref<8x1024xf32, #tpu.memory_space<vmem>>, vector<8x128xf32>,
    %207 = vector.extract_strided_slice %196 {offsets = [40, 0], sizes = [8, 128], strides = [1, 1]} : vector<64x128xf32> to vector<8x128xf32>
    %c0_62 = arith.constant 0 : index
    %c640 = arith.constant 640 : index
    %208 = vector.load %arg7[%c0_62, %c640] : memref<8x1024xf32, #tpu.memory_space<vmem>>, vector<8x128xf32>
    tpu.vector_store %arg7[%c0_62, %c640], %207 {strides = array<i32>} : memref<8x1024xf32, #tpu.memory_space<vmem>>, vector<8x128xf32>,
    %209 = vector.extract_strided_slice %196 {offsets = [48, 0], sizes = [8, 128], strides = [1, 1]} : vector<64x128xf32> to vector<8x128xf32>
    %c0_63 = arith.constant 0 : index
    %c768 = arith.constant 768 : index
    %210 = vector.load %arg7[%c0_63, %c768] : memref<8x1024xf32, #tpu.memory_space<vmem>>, vector<8x128xf32>
    tpu.vector_store %arg7[%c0_63, %c768], %209 {strides = array<i32>} : memref<8x1024xf32, #tpu.memory_space<vmem>>, vector<8x128xf32>,
    %211 = vector.extract_strided_slice %196 {offsets = [56, 0], sizes = [8, 128], strides = [1, 1]} : vector<64x128xf32> to vector<8x128xf32>
    %c0_64 = arith.constant 0 : index
    %c896 = arith.constant 896 : index
    %212 = vector.load %arg7[%c0_64, %c896] : memref<8x1024xf32, #tpu.memory_space<vmem>>, vector<8x128xf32>
    tpu.vector_store %arg7[%c0_64, %c896], %211 {strides = array<i32>} : memref<8x1024xf32, #tpu.memory_space<vmem>>, vector<8x128xf32>,
    return
  }
}

</mosaic_0001>

<bundles_post_ra>
// kernel: decoder_rnn_forward.1
= control target key start
LH: loop header
LB: loop body
LE: loop exit
PB: predicated region body
PF: predicated region fallthrough
CT: control target
= control target key end

     0   :  { %12 = vsyncpa [#allocation4], 0  ;;  %s1687_s0 = inlined_call_operand.vmem [shape: f32[8,64], index: 0, kind: input, shape index: {}]   ;;  %s1688_s1 = inlined_call_operand.vmem [shape: f32[8,32], index: 1, kind: input, shape index: {}]   ;;  %s1689_s2 = inlined_call_operand.hbm [shape: f32[64,128], index: 2, kind: input, shape index: {}]   ;;  %s1690_s3 = inlined_call_operand.hbm [shape: f32[32,128], index: 3, kind: input, shape index: {}]   ;;  %s1691_s4 = inlined_call_operand.vmem [shape: f32[1,128], index: 4, kind: input, shape index: {}]   ;;  %s1692_s5 = inlined_call_operand.hbm [shape: f32[32,128], index: 5, kind: input, shape index: {}]   ;;  %s1693_s6 = inlined_call_operand.vmem [shape: f32[1,128], index: 6, kind: input, shape index: {}]   ;;  %s1694_s7 = inlined_call_operand.vmem [shape: f32[8,1024], index: 7, kind: output, shape index: {}]  }
   0x1   :  { %13 = vsyncpa [#allocation6], 0  ;;  %s1425_s24 = smov [#allocation5]   ;;  %s1426_s26 = smov [#allocation3]  }
   0x2   :  { %s35_s25 = sshll.u32 %s1425_s24, 4  ;;  %s23_s27 = sshll.u32 %s1426_s26, 4  ;;  %s36_s25 = int_to_ptr.vmem [resolvable:$true] %s35_s25  ;;  %s24_s27 = int_to_ptr.vmem [resolvable:$true] %s23_s27 }
   0x3   :  { %s1369_s28 = scalar_lea.vmem %s36_s25, 512  ;;  %p1374_p1 = scmp.lt.s32.totalorder %s36_s25, %s36_s25 }
   0x4   :  { %p1370_p0 = scmp.ne.s32.totalorder %s36_s25, %s1369_s28  ;;  %p1375_p2 = scmp.lt.s32.totalorder %s1369_s28, %s1369_s28 }
   0x6   :  { %p1376_p3 = por %p1375_p2, %p1374_p1 }
   0x8   :  { %p1377_p4 = pnand %p1376_p3, %p1370_p0 }
   0xa   :  { %1380 = shalt.err (!%p1377_p4)
}
   0xb   :  { %s1427_s29 = smov 128   ;;  %s1428_s30 = smov 8  }
   0xc   :  { %41 = dma.hbm_to_vmem [thread:$0]  %s1690_s3, 512, %s36_s25, [#allocation6], %s1427_s29, %s1427_s29, %s1428_s30  }
   0xd   :  { %s1389_s10 = scalar_lea.vmem %s24_s27, 1024  ;;  %p1394_p6 = scmp.lt.s32.totalorder %s24_s27, %s24_s27 }
   0xe   :  { %p1390_p5 = scmp.ne.s32.totalorder %s24_s27, %s1389_s10  ;;  %p1395_p7 = scmp.lt.s32.totalorder %s1389_s10, %s1389_s10 }
  0x10   :  { %p1396_p8 = por %p1395_p7, %p1394_p6 }
  0x12   :  { %p1397_p9 = pnand %p1396_p8, %p1390_p5 }
  0x14   :  { %1400 = shalt.err (!%p1397_p9)
}
  0x15   :  { %29 = dma.hbm_to_vmem [thread:$0]  %s1689_s2, 1024, %s24_s27, [#allocation4], %s1427_s29, %s1427_s29, %s1428_s30  }
  0x16   :  { %s1429_s13 = smov [#allocation7]  }
  0x17   :  { %s49_s14 = sshll.u32 %s1429_s13, 4  ;;  %s50_s14 = int_to_ptr.vmem [resolvable:$true] %s49_s14 }
  0x18   :  { %s1409_s15 = scalar_lea.vmem %s50_s14, 512  ;;  %p1414_p11 = scmp.lt.s32.totalorder %s50_s14, %s50_s14 }
  0x19   :  { %p1410_p10 = scmp.ne.s32.totalorder %s50_s14, %s1409_s15  ;;  %p1415_p12 = scmp.lt.s32.totalorder %s1409_s15, %s1409_s15 }
  0x1b   :  { %p1416_p13 = por %p1415_p12, %p1414_p11 }
  0x1d   :  { %p1417_p0 = pnand %p1416_p13, %p1410_p10 }
  0x1f   :  { %1420 = shalt.err (!%p1417_p0)
}
  0x20   :  { %55 = dma.hbm_to_vmem [thread:$0]  %s1692_s5, 512, %s50_s14, [#allocation6], %s1427_s29, %s1427_s29, %s1428_s30  }
  0x21   :  { %1421 = dma.done.wait [#allocation4], 1024  }
  0x22   :  { %1422 = vsyncadd [#allocation4], 4294966272 }
  0x23   :  { %1423 = dma.done.wait [#allocation6], 1024  }
  0x24   :  { %1424 = vsyncadd [#allocation6], 4294966272  ;;  %v1430_v0 = vmov 0.0   ;;  %vm1431_vm0 = vmmov 0   ;;  %v87_v1 = vld [vmem:[#allocation3 + $0x38] sm:$0xff]  ;;  %v86_v2 = vld [vmem:[#allocation3 + $0x30] sm:$0xff] }
  0x25   :  { %1188 = vmatprep.subr.mxu0 %v1430_v0  ;;  %1204 = vmatprep.mubr.msk.f32.mxu0 %vm1431_vm0, %v1430_v0  ;;  %v85_v3 = vld [vmem:[#allocation3 + $0x28] sm:$0xff]  ;;  %v84_v4 = vld [vmem:[#allocation3 + $0x20] sm:$0xff]  ;;  %v83_v5 = vld [vmem:[#allocation3 + $0x18] sm:$0xff]  ;;  %vm88_vm1 = vcmask 523264   ;;  %s1433_s20 = smov 32   ;;  %vm199_vm2 = vcmask 261120  }
  0x26   :  { %1218 = vmatprep.subr.mxu1 %v1430_v0  ;;  %1226 = vmatprep.mubr.msk.f32.mxu1 %vm1431_vm0, %v1430_v0  ;;  %v82_v6 = vld [vmem:[#allocation3 + $0x10] sm:$0xff]  ;;  %v81_v7 = vld [vmem:[#allocation3 + $0x8] sm:$0xff]  ;;  %v80_v8 = vld [vmem:[#allocation3] sm:$0xff] }
  0x27   :  { %1189 = vmatpush3.msra.mxu0 %v87_v1  ;;  %v79_v9 = vld [vmem:[%s1687_s0] sm:$0xff]  ;;  %s1432_s0 = smov 64   ;;  %v1514_v30 = vld [vmem:[#allocation5 + $0x18] sm:$0xff]  ;;  %v1516_v31 = vld [vmem:[#allocation5 + $0x10] sm:$0xff] }
  0x28   :  { %1190 = vmatprep.subr.mxu0 %v1430_v0  ;;  %v1505_v10 = vld [vmem:[%s1691_s4] ss:$0 sm:$0xff]  ;;  %1219 = vmatpush3.msra.mxu1 %v1514_v30  ;;  %v1521_v32 = vld [vmem:[#allocation5 + $0x8] sm:$0xff] }
  0x29   :  { %1191 = vmatpush3.msra.mxu0 %v86_v2  ;;  %v162_v23 = vld [vmem:[%s1688_s1] sm:$0xff]  ;;  %1220 = vmatprep.subr.mxu1 %v1430_v0 }
  0x2a   :  { %1192 = vmatprep.subr.mxu0 %v1430_v0  ;;  %1221 = vmatpush3.msra.mxu1 %v1516_v31  ;;  %v1527_v33 = vld [vmem:[#allocation5] sm:$0xff] }
  0x2b   :  { %1193 = vmatpush3.msra.mxu0 %v85_v3  ;;  %1222 = vmatprep.subr.mxu1 %v1430_v0 }
  0x2c   :  { %1194 = vmatprep.subr.mxu0 %v1430_v0  ;;  %1223 = vmatpush3.msra.mxu1 %v1521_v32 }
  0x2d   :  { %1195 = vmatpush3.msra.mxu0 %v84_v4  ;;  %1224 = vmatprep.subr.mxu1 %v1430_v0 }
  0x2e   :  { %1196 = vmatprep.subr.mxu0 %v1430_v0  ;;  %1225 = vmatpush3.msra.mxu1 %v1527_v33 }
  0x2f   :  { %1197 = vmatpush3.msra.mxu0 %v83_v5  ;;  %1240 = vmatprep.subr.mxu1 %v1430_v0 }
  0x30   :  { %1198 = vmatprep.subr.mxu0 %v1430_v0 }
  0x31   :  { %1199 = vmatpush3.msra.mxu0 %v82_v6 }
  0x32   :  { %1200 = vmatprep.subr.mxu0 %v1430_v0 }
  0x33   :  { %1201 = vmatpush3.msra.mxu0 %v81_v7 }
  0x34   :  { %1202 = vmatprep.subr.mxu0 %v1430_v0 }
  0x35   :  { %1203 = vmatpush3.msra.mxu0 %v80_v8 }
  0x36   :  { %1205 = vmatmul.mubr.msk.f32.vlgmr.msra.gmra.mxu0 %vm88_vm1, %v79_v9  ;;  %1207 = vmatprep.subr.mxu0 %v1430_v0 }
  0x37   :  { %1215 = vmatprep.mubr.msk.f32.mxu0 %vm1431_vm0, %v1430_v0  ;;  %1208 = vmatpush3.msra.mxu0 %v1514_v30 }
  0x38   :  { %1209 = vmatprep.subr.mxu0 %v1430_v0 }
  0x39   :  { %1210 = vmatpush3.msra.mxu0 %v1516_v31 }
  0x3a   :  { %1211 = vmatprep.subr.mxu0 %v1430_v0 }
  0x3b   :  { %1212 = vmatpush3.msra.mxu0 %v1521_v32 }
  0x3c   :  { %1213 = vmatprep.subr.mxu0 %v1430_v0 }
  0x3d   :  { %1214 = vmatpush3.msra.mxu0 %v1527_v33 }
  0x3e   :  { %1229 = vmatprep.subr.mxu0 %v1430_v0 }
  0xf6   :  { %v158_v11 = vpop.f32.mrf.mxu0 }
  0xf7   :  { %v159_v12 = vadd.f32 %v1505_v10, %v158_v11 }
  0xf8   :  { %v1206_v13 = vpop.f32.mrf.mxu0 }
  0xf9   :  { %v163_v14 = vpack.c.bf16 %v159_v12, %v159_v12 }
  0xfb   :  { %v1100_v15 = vmul.bf16 3216621497, %v163_v14 }
  0xfd   :  { %1313 = vpow.bf16 %v1100_v15 }
 0x10b   :  { %v1314_v16 = vpop.eup %1313 }
 0x10c   :  { %v168_v17 = vadd.bf16 1065369472, %v1314_v16 }
 0x10e   :  { %1315 = vrcp.bf16 %v168_v17 }
 0x11c   :  { %v1316_v18 = vpop.eup %1315 }
 0x11d   :  { %v170_v19 = vmul.bf16 1065369472, %v1316_v18 }
 0x11f   :  { %v171_v20 = vunpack.c.l.bf16 %v170_v19 }
 0x121   :  { %v172_v21 = vmul.f32 2.0, %v171_v20 }
 0x123   :  { %v1101_v22 = vadd.f32 -1.0, %v172_v21 }
 0x125   :  { %180 = vrot.lane.b32.xlu0 %v1101_v22, %s1432_s0 }
 0x129   :  { %175 = vrot.lane.b32.xlu0 %v162_v23, %s1433_s20 }
 0x197   :  { %v181_v24 = vpop.permute.xlu0 %180 }
 0x198   :  { %v183_v25 = vmul.f32 %v181_v24, %v171_v20 }
 0x19a   :  { %185 = vrot.lane.b32.xlu1 %v183_v25, %s1433_s20 }
 0x19b   :  { %v176_v26 = vpop.permute.xlu0 %175 }
 0x19c   :  { %v178_v27 = vmul.f32 %v176_v26, %v171_v20 }
 0x20c   :  { %v186_v28 = vpop.permute.xlu1 %185 }
 0x20d   :  { %v188_v29 = vadd.f32 %v186_v28, %v178_v27 }
 0x20f   :  { %1317 = vtanh.f32 %v188_v29 }
 0x21c   :  { %v1318_v34 = vpop.eup %1317 }
 0x21d   :  { %191 = vrot.lane.b32.xlu1 %v1318_v34, %s1432_s0 }
 0x28f   :  { %v192_v35 = vpop.permute.xlu1 %191 }
 0x290   :  { %v194_v36 = vmul.f32 %v192_v35, %v171_v20 }
 0x292   :  { %196 = vrot.lane.b32.xlu0 %v194_v36, %s1433_s20 }
 0x304   :  { %v197_v37 = vpop.permute.xlu0 %196 }
 0x305   :  { %200 = vst.msk [vmem:[#allocation2] sm:$0xff] %vm199_vm2, %v197_v37  ;;  %1216 = vmatmul.mubr.msk.f32.vlgmr.msra.gmra.mxu0 %vm199_vm2, %v197_v37 }
 0x306   :  { %1230 = vmatpush3.msra.mxu0 %v1514_v30  ;;  %1237 = vmatprep.mubr.msk.f32.mxu0 %vm1431_vm0, %v1430_v0 }
 0x307   :  { %1231 = vmatprep.subr.mxu0 %v1430_v0 }
 0x308   :  { %1232 = vmatpush3.msra.mxu0 %v1516_v31 }
 0x309   :  { %1233 = vmatprep.subr.mxu0 %v1430_v0 }
 0x30a   :  { %1234 = vmatpush3.msra.mxu0 %v1521_v32 }
 0x30b   :  { %1235 = vmatprep.subr.mxu0 %v1430_v0 }
 0x30c   :  { %1236 = vmatpush3.msra.mxu0 %v1527_v33 }
 0x30d   :  { %1251 = vmatprep.subr.mxu0 %v1430_v0 }
 0x3c5   :  { %v269_v38 = vpop.f32.mrf.mxu0 }
 0x3c6   :  { %v270_v39 = vadd.f32 %v1505_v10, %v269_v38 }
 0x3c7   :  { %v1217_v40 = vpop.f32.mrf.mxu0 }
 0x3c8   :  { %v273_v41 = vpack.c.bf16 %v270_v39, %v270_v39 }
 0x3ca   :  { %v1103_v42 = vmul.bf16 3216621497, %v273_v41 }
 0x3cc   :  { %1319 = vpow.bf16 %v1103_v42 }
 0x3da   :  { %v1320_v43 = vpop.eup %1319 }
 0x3db   :  { %v278_v44 = vadd.bf16 1065369472, %v1320_v43 }
 0x3dd   :  { %1321 = vrcp.bf16 %v278_v44 }
 0x3eb   :  { %v1322_v45 = vpop.eup %1321 }
 0x3ec   :  { %v280_v46 = vmul.bf16 1065369472, %v1322_v45 }
 0x3ee   :  { %v281_v47 = vunpack.c.l.bf16 %v280_v46 }
 0x3f0   :  { %v282_v48 = vmul.f32 2.0, %v281_v47  ;;  %v284_v52 = vmul.f32 %v281_v47, %v188_v29 }
 0x3f2   :  { %v1104_v49 = vadd.f32 -1.0, %v282_v48 }
 0x3f4   :  { %286 = vrot.lane.b32.xlu1 %v1104_v49, %s1432_s0 }
 0x466   :  { %v287_v50 = vpop.permute.xlu1 %286 }
 0x467   :  { %v289_v51 = vmul.f32 %v287_v50, %v281_v47 }
 0x469   :  { %291 = vrot.lane.b32.xlu0 %v289_v51, %s1433_s20 }
 0x4db   :  { %v292_v53 = vpop.permute.xlu0 %291 }
 0x4dc   :  { %v294_v54 = vadd.f32 %v292_v53, %v284_v52 }
 0x4de   :  { %1323 = vtanh.f32 %v294_v54 }
 0x4eb   :  { %v1324_v55 = vpop.eup %1323 }
 0x4ec   :  { %297 = vrot.lane.b32.xlu1 %v1324_v55, %s1432_s0 }
 0x55e   :  { %v298_v56 = vpop.permute.xlu1 %297 }
 0x55f   :  { %v300_v57 = vmul.f32 %v298_v56, %v281_v47 }
 0x561   :  { %302 = vrot.lane.b32.xlu0 %v300_v57, %s1433_s20 }
 0x5d3   :  { %v303_v58 = vpop.permute.xlu0 %302 }
 0x5d4   :  { %305 = vst.msk [vmem:[#allocation2 + $0x8] sm:$0xff] %vm199_vm2, %v303_v58  ;;  %1227 = vmatmul.mubr.msk.f32.vlgmr.msra.gmra.mxu1 %vm199_vm2, %v303_v58 }
 0x5d5   :  { %1241 = vmatpush3.msra.mxu1 %v1514_v30  ;;  %1248 = vmatprep.mubr.msk.f32.mxu1 %vm1431_vm0, %v1430_v0 }
 0x5d6   :  { %1242 = vmatprep.subr.mxu1 %v1430_v0 }
 0x5d7   :  { %1243 = vmatpush3.msra.mxu1 %v1516_v31 }
 0x5d8   :  { %1244 = vmatprep.subr.mxu1 %v1430_v0 }
 0x5d9   :  { %1245 = vmatpush3.msra.mxu1 %v1521_v32 }
 0x5da   :  { %1246 = vmatprep.subr.mxu1 %v1430_v0 }
 0x5db   :  { %1247 = vmatpush3.msra.mxu1 %v1527_v33 }
 0x5dc   :  { %1262 = vmatprep.subr.mxu1 %v1430_v0 }
 0x694   :  { %v374_v59 = vpop.f32.mrf.mxu1 }
 0x695   :  { %v375_v60 = vadd.f32 %v1505_v10, %v374_v59 }
 0x696   :  { %v1228_v61 = vpop.f32.mrf.mxu1 }
 0x697   :  { %v378_v62 = vpack.c.bf16 %v375_v60, %v375_v60 }
 0x699   :  { %v1106_v63 = vmul.bf16 3216621497, %v378_v62 }
 0x69b   :  { %1325 = vpow.bf16 %v1106_v63 }
 0x6a9   :  { %v1326_v1 = vpop.eup %1325 }
 0x6aa   :  { %v383_v2 = vadd.bf16 1065369472, %v1326_v1 }
 0x6ac   :  { %1327 = vrcp.bf16 %v383_v2 }
 0x6ba   :  { %v1328_v3 = vpop.eup %1327 }
 0x6bb   :  { %v385_v4 = vmul.bf16 1065369472, %v1328_v3 }
 0x6bd   :  { %v386_v5 = vunpack.c.l.bf16 %v385_v4 }
 0x6bf   :  { %v387_v6 = vmul.f32 2.0, %v386_v5  ;;  %v389_v11 = vmul.f32 %v386_v5, %v294_v54 }
 0x6c1   :  { %v1107_v7 = vadd.f32 -1.0, %v387_v6 }
 0x6c3   :  { %391 = vrot.lane.b32.xlu1 %v1107_v7, %s1432_s0 }
 0x735   :  { %v392_v8 = vpop.permute.xlu1 %391 }
 0x736   :  { %v394_v9 = vmul.f32 %v392_v8, %v386_v5 }
 0x738   :  { %396 = vrot.lane.b32.xlu0 %v394_v9, %s1433_s20 }
 0x7aa   :  { %v397_v12 = vpop.permute.xlu0 %396 }
 0x7ab   :  { %v399_v13 = vadd.f32 %v397_v12, %v389_v11 }
 0x7ad   :  { %1329 = vtanh.f32 %v399_v13 }
 0x7ba   :  { %v1330_v14 = vpop.eup %1329 }
 0x7bb   :  { %402 = vrot.lane.b32.xlu1 %v1330_v14, %s1432_s0  ;;  %v947_v14 = vld [vmem:[#allocation7 + $0x18] sm:$0xff] }
 0x82d   :  { %v403_v15 = vpop.permute.xlu1 %402 }
 0x82e   :  { %v405_v16 = vmul.f32 %v403_v15, %v386_v5 }
 0x830   :  { %407 = vrot.lane.b32.xlu0 %v405_v16, %s1433_s20 }
 0x8a2   :  { %v408_v17 = vpop.permute.xlu0 %407 }
 0x8a3   :  { %410 = vst.msk [vmem:[#allocation2 + $0x10] sm:$0xff] %vm199_vm2, %v408_v17  ;;  %1238 = vmatmul.mubr.msk.f32.vlgmr.msra.gmra.mxu0 %vm199_vm2, %v408_v17 }
 0x8a4   :  { %1252 = vmatpush3.msra.mxu0 %v1514_v30  ;;  %1259 = vmatprep.mubr.msk.f32.mxu0 %vm1431_vm0, %v1430_v0 }
 0x8a5   :  { %1253 = vmatprep.subr.mxu0 %v1430_v0 }
 0x8a6   :  { %1254 = vmatpush3.msra.mxu0 %v1516_v31 }
 0x8a7   :  { %1255 = vmatprep.subr.mxu0 %v1430_v0 }
 0x8a8   :  { %1256 = vmatpush3.msra.mxu0 %v1521_v32 }
 0x8a9   :  { %1257 = vmatprep.subr.mxu0 %v1430_v0 }
 0x8aa   :  { %1258 = vmatpush3.msra.mxu0 %v1527_v33 }
 0x8ab   :  { %1273 = vmatprep.subr.mxu0 %v1430_v0 }
 0x963   :  { %v479_v18 = vpop.f32.mrf.mxu0 }
 0x964   :  { %v480_v19 = vadd.f32 %v1505_v10, %v479_v18 }
 0x965   :  { %v1239_v20 = vpop.f32.mrf.mxu0 }
 0x966   :  { %v483_v21 = vpack.c.bf16 %v480_v19, %v480_v19  ;;  %v946_v19 = vld [vmem:[#allocation7 + $0x10] sm:$0xff]  ;;  %v936_v20 = vld [vmem:[#allocation2] sm:$0xff] }
 0x968   :  { %v1109_v22 = vmul.bf16 3216621497, %v483_v21  ;;  %v945_v21 = vld [vmem:[#allocation7 + $0x8] sm:$0xff] }
 0x96a   :  { %1331 = vpow.bf16 %v1109_v22  ;;  %v944_v22 = vld [vmem:[#allocation7] sm:$0xff] }
 0x978   :  { %v1332_v23 = vpop.eup %1331 }
 0x979   :  { %v488_v24 = vadd.bf16 1065369472, %v1332_v23  ;;  %v937_v23 = vld [vmem:[#allocation2 + $0x8] sm:$0xff] }
 0x97b   :  { %1333 = vrcp.bf16 %v488_v24  ;;  %v938_v24 = vld [vmem:[#allocation2 + $0x10] sm:$0xff] }
 0x989   :  { %v1334_v25 = vpop.eup %1333 }
 0x98a   :  { %v490_v26 = vmul.bf16 1065369472, %v1334_v25 }
 0x98c   :  { %v491_v27 = vunpack.c.l.bf16 %v490_v26 }
 0x98e   :  { %v492_v28 = vmul.f32 2.0, %v491_v27  ;;  %v494_v36 = vmul.f32 %v491_v27, %v399_v13 }
 0x990   :  { %v1110_v29 = vadd.f32 -1.0, %v492_v28 }
 0x992   :  { %496 = vrot.lane.b32.xlu1 %v1110_v29, %s1432_s0 }
 0xa04   :  { %v497_v34 = vpop.permute.xlu1 %496 }
 0xa05   :  { %v499_v35 = vmul.f32 %v497_v34, %v491_v27 }
 0xa07   :  { %501 = vrot.lane.b32.xlu0 %v499_v35, %s1433_s20 }
 0xa79   :  { %v502_v37 = vpop.permute.xlu0 %501 }
 0xa7a   :  { %v504_v38 = vadd.f32 %v502_v37, %v494_v36  ;;  %v1638_v37 = vld [vmem:[%s1693_s6] ss:$0 sm:$0xff] }
 0xa7c   :  { %1335 = vtanh.f32 %v504_v38 }
 0xa89   :  { %v1336_v39 = vpop.eup %1335 }
 0xa8a   :  { %507 = vrot.lane.b32.xlu1 %v1336_v39, %s1432_s0 }
 0xafc   :  { %v508_v40 = vpop.permute.xlu1 %507 }
 0xafd   :  { %v510_v41 = vmul.f32 %v508_v40, %v491_v27 }
 0xaff   :  { %512 = vrot.lane.b32.xlu0 %v510_v41, %s1433_s20 }
 0xb71   :  { %v513_v42 = vpop.permute.xlu0 %512 }
 0xb72   :  { %515 = vst.msk [vmem:[#allocation2 + $0x18] sm:$0xff] %vm199_vm2, %v513_v42  ;;  %1249 = vmatmul.mubr.msk.f32.vlgmr.msra.gmra.mxu1 %vm199_vm2, %v513_v42 }
 0xb73   :  { %1263 = vmatpush3.msra.mxu1 %v1514_v30  ;;  %1270 = vmatprep.mubr.msk.f32.mxu1 %vm1431_vm0, %v1430_v0 }
 0xb74   :  { %1264 = vmatprep.subr.mxu1 %v1430_v0 }
 0xb75   :  { %1265 = vmatpush3.msra.mxu1 %v1516_v31 }
 0xb76   :  { %1266 = vmatprep.subr.mxu1 %v1430_v0 }
 0xb77   :  { %1267 = vmatpush3.msra.mxu1 %v1521_v32 }
 0xb78   :  { %1268 = vmatprep.subr.mxu1 %v1430_v0 }
 0xb79   :  { %1269 = vmatpush3.msra.mxu1 %v1527_v33  ;;  %v939_v25 = vld [vmem:[#allocation2 + $0x18] sm:$0xff] }
 0xb7a   :  { %1284 = vmatprep.subr.mxu1 %v947_v14 }
 0xc32   :  { %v584_v43 = vpop.f32.mrf.mxu1 }
 0xc33   :  { %v585_v44 = vadd.f32 %v1505_v10, %v584_v43 }
 0xc34   :  { %v1250_v45 = vpop.f32.mrf.mxu1 }
 0xc35   :  { %v588_v46 = vpack.c.bf16 %v585_v44, %v585_v44 }
 0xc37   :  { %v1112_v47 = vmul.bf16 3216621497, %v588_v46 }
 0xc39   :  { %1337 = vpow.bf16 %v1112_v47 }
 0xc47   :  { %v1338_v48 = vpop.eup %1337 }
 0xc48   :  { %v593_v49 = vadd.bf16 1065369472, %v1338_v48 }
 0xc4a   :  { %1339 = vrcp.bf16 %v593_v49 }
 0xc58   :  { %v1340_v50 = vpop.eup %1339 }
 0xc59   :  { %v595_v51 = vmul.bf16 1065369472, %v1340_v50 }
 0xc5b   :  { %v596_v52 = vunpack.c.l.bf16 %v595_v51 }
 0xc5d   :  { %v597_v53 = vmul.f32 2.0, %v596_v52  ;;  %v599_v57 = vmul.f32 %v596_v52, %v504_v38 }
 0xc5f   :  { %v1113_v54 = vadd.f32 -1.0, %v597_v53 }
 0xc61   :  { %601 = vrot.lane.b32.xlu1 %v1113_v54, %s1432_s0 }
 0xcd3   :  { %v602_v55 = vpop.permute.xlu1 %601 }
 0xcd4   :  { %v604_v56 = vmul.f32 %v602_v55, %v596_v52 }
 0xcd6   :  { %606 = vrot.lane.b32.xlu0 %v604_v56, %s1433_s20 }
 0xd48   :  { %v607_v58 = vpop.permute.xlu0 %606 }
 0xd49   :  { %v609_v59 = vadd.f32 %v607_v58, %v599_v57 }
 0xd4b   :  { %1341 = vtanh.f32 %v609_v59 }
 0xd58   :  { %v1342_v60 = vpop.eup %1341 }
 0xd59   :  { %612 = vrot.lane.b32.xlu1 %v1342_v60, %s1432_s0 }
 0xdcb   :  { %v613_v61 = vpop.permute.xlu1 %612 }
 0xdcc   :  { %v615_v62 = vmul.f32 %v613_v61, %v596_v52 }
 0xdce   :  { %617 = vrot.lane.b32.xlu0 %v615_v62, %s1433_s20 }
 0xe40   :  { %v618_v63 = vpop.permute.xlu0 %617 }
 0xe41   :  { %620 = vst.msk [vmem:[#allocation2 + $0x20] sm:$0xff] %vm199_vm2, %v618_v63  ;;  %1260 = vmatmul.mubr.msk.f32.vlgmr.msra.gmra.mxu0 %vm199_vm2, %v618_v63 }
 0xe42   :  { %1274 = vmatpush3.msra.mxu0 %v1514_v30  ;;  %1281 = vmatprep.mubr.msk.f32.mxu0 %vm1431_vm0, %v1430_v0 }
 0xe43   :  { %1275 = vmatprep.subr.mxu0 %v1430_v0 }
 0xe44   :  { %1276 = vmatpush3.msra.mxu0 %v1516_v31 }
 0xe45   :  { %1277 = vmatprep.subr.mxu0 %v1430_v0 }
 0xe46   :  { %1278 = vmatpush3.msra.mxu0 %v1521_v32 }
 0xe47   :  { %1279 = vmatprep.subr.mxu0 %v1430_v0 }
 0xe48   :  { %1280 = vmatpush3.msra.mxu0 %v1527_v33  ;;  %v940_v26 = vld [vmem:[#allocation2 + $0x20] sm:$0xff] }
 0xf01   :  { %v689_v1 = vpop.f32.mrf.mxu0 }
 0xf02   :  { %v690_v2 = vadd.f32 %v1505_v10, %v689_v1 }
 0xf03   :  { %v1261_v3 = vpop.f32.mrf.mxu0 }
 0xf04   :  { %v693_v30 = vpack.c.bf16 %v690_v2, %v690_v2 }
 0xf06   :  { %v1115_v4 = vmul.bf16 3216621497, %v693_v30 }
 0xf08   :  { %1343 = vpow.bf16 %v1115_v4 }
 0xf16   :  { %v1344_v5 = vpop.eup %1343 }
 0xf17   :  { %v698_v6 = vadd.bf16 1065369472, %v1344_v5 }
 0xf19   :  { %1345 = vrcp.bf16 %v698_v6 }
 0xf27   :  { %v1346_v7 = vpop.eup %1345 }
 0xf28   :  { %v700_v31 = vmul.bf16 1065369472, %v1346_v7 }
 0xf2a   :  { %v701_v8 = vunpack.c.l.bf16 %v700_v31 }
 0xf2c   :  { %v702_v9 = vmul.f32 2.0, %v701_v8  ;;  %v704_v33 = vmul.f32 %v701_v8, %v609_v59 }
 0xf2e   :  { %v1116_v11 = vadd.f32 -1.0, %v702_v9 }
 0xf30   :  { %706 = vrot.lane.b32.xlu1 %v1116_v11, %s1432_s0 }
 0xfa2   :  { %v707_v0 = vpop.permute.xlu1 %706 }
 0xfa3   :  { %v709_v32 = vmul.f32 %v707_v0, %v701_v8 }
 0xfa5   :  { %711 = vrot.lane.b32.xlu0 %v709_v32, %s1433_s20 }
0x1017   :  { %v712_v12 = vpop.permute.xlu0 %711 }
0x1018   :  { %v1621_v13 = vadd.f32 %v712_v12, %v704_v33 }
0x101a   :  { %1347 = vtanh.f32 %v1621_v13 }
0x1027   :  { %v1348_v15 = vpop.eup %1347 }
0x1028   :  { %717 = vrot.lane.b32.xlu1 %v1348_v15, %s1432_s0 }
0x109a   :  { %v718_v16 = vpop.permute.xlu1 %717 }
0x109b   :  { %v720_v17 = vmul.f32 %v718_v16, %v701_v8 }
0x109d   :  { %722 = vrot.lane.b32.xlu0 %v720_v17, %s1433_s20 }
0x110f   :  { %v723_v18 = vpop.permute.xlu0 %722 }
0x1110   :  { %725 = vst.msk [vmem:[#allocation2 + $0x28] sm:$0xff] %vm199_vm2, %v723_v18  ;;  %1271 = vmatmul.mubr.msk.f32.vlgmr.msra.gmra.mxu1 %vm199_vm2, %v723_v18 }
0x1111   :  { %1285 = vmatpush3.msra.mxu1 %v947_v14  ;;  %1292 = vmatprep.mubr.msk.f32.mxu1 %vm199_vm2, %v936_v20 }
0x1112   :  { %1286 = vmatprep.subr.mxu1 %v946_v19 }
0x1113   :  { %1287 = vmatpush3.msra.mxu1 %v946_v19 }
0x1114   :  { %1288 = vmatprep.subr.mxu1 %v945_v21 }
0x1115   :  { %1289 = vmatpush3.msra.mxu1 %v945_v21 }
0x1116   :  { %1290 = vmatprep.subr.mxu1 %v944_v22 }
0x1117   :  { %1291 = vmatpush3.msra.mxu1 %v944_v22  ;;  %v941_v27 = vld [vmem:[#allocation2 + $0x28] sm:$0xff] }
0x1118   :  { %1293 = vmatmul.mubr.msk.f32.vlgmr.msra.gmra.mxu1 %vm199_vm2, %v937_v23 }
0x1119   :  { %1295 = vmatprep.mubr.msk.f32.mxu1 %vm199_vm2, %v938_v24 }
0x111c   :  { %1296 = vmatmul.mubr.msk.f32.gmra.mxu1 %vm199_vm2, %v939_v25 }
0x111d   :  { %1298 = vmatprep.mubr.msk.f32.mxu1 %vm199_vm2, %v940_v26 }
0x1120   :  { %1299 = vmatmul.mubr.msk.f32.gmra.mxu1 %vm199_vm2, %v941_v27 }
0x11d0   :  { %v794_v28 = vpop.f32.mrf.mxu1 }
0x11d1   :  { %v795_v29 = vadd.f32 %v1505_v10, %v794_v28 }
0x11d2   :  { %v1272_v34 = vpop.f32.mrf.mxu1 }
0x11d3   :  { %v798_v35 = vpack.c.bf16 %v795_v29, %v795_v29 }
0x11d5   :  { %v1118_v36 = vmul.bf16 3216621497, %v798_v35 }
0x11d7   :  { %1349 = vpow.bf16 %v1118_v36 }
0x11d8   :  { %v1294_v38 = vpop.f32.mrf.mxu1 }
0x11d9   :  { %v1051_v39 = vadd.f32 %v1294_v38, %v1638_v37 }
0x11da   :  { %v1045_v40 = vpop.f32.mrf.mxu1 }
0x11db   :  { %1085 = vst [vmem:[%s1694_s7 + $0x8] sm:$0xff] %v1051_v39  ;;  %v1046_v41 = vadd.f32 %v1638_v37, %v1045_v40 }
0x11dc   :  { %v1297_v42 = vpop.f32.mrf.mxu1 }
0x11dd   :  { %1084 = vst [vmem:[%s1694_s7] sm:$0xff] %v1046_v41  ;;  %v1061_v43 = vadd.f32 %v1297_v42, %v1638_v37 }
0x11de   :  { %v1055_v44 = vpop.f32.mrf.mxu1 }
0x11df   :  { %1087 = vst [vmem:[%s1694_s7 + $0x18] sm:$0xff] %v1061_v43  ;;  %v1056_v45 = vadd.f32 %v1638_v37, %v1055_v44 }
0x11e0   :  { %v1300_v46 = vpop.f32.mrf.mxu1 }
0x11e1   :  { %1086 = vst [vmem:[%s1694_s7 + $0x10] sm:$0xff] %v1056_v45  ;;  %v1071_v47 = vadd.f32 %v1300_v46, %v1638_v37 }
0x11e2   :  { %v1065_v48 = vpop.f32.mrf.mxu1 }
0x11e3   :  { %1089 = vst [vmem:[%s1694_s7 + $0x28] sm:$0xff] %v1071_v47  ;;  %v1066_v49 = vadd.f32 %v1638_v37, %v1065_v48 }
0x11e5   :  { %v1350_v50 = vpop.eup %1349  ;;  %1088 = vst [vmem:[%s1694_s7 + $0x20] sm:$0xff] %v1066_v49 }
0x11e6   :  { %v803_v51 = vadd.bf16 1065369472, %v1350_v50 }
0x11e8   :  { %1351 = vrcp.bf16 %v803_v51 }
0x11f6   :  { %v1352_v52 = vpop.eup %1351 }
0x11f7   :  { %v805_v53 = vmul.bf16 1065369472, %v1352_v52 }
0x11f9   :  { %v806_v54 = vunpack.c.l.bf16 %v805_v53 }
0x11fb   :  { %v807_v55 = vmul.f32 2.0, %v806_v54  ;;  %v809_v59 = vmul.f32 %v806_v54, %v1621_v13 }
0x11fd   :  { %v1119_v56 = vadd.f32 -1.0, %v807_v55 }
0x11ff   :  { %811 = vrot.lane.b32.xlu1 %v1119_v56, %s1432_s0 }
0x1271   :  { %v812_v57 = vpop.permute.xlu1 %811 }
0x1272   :  { %v814_v58 = vmul.f32 %v812_v57, %v806_v54 }
0x1274   :  { %816 = vrot.lane.b32.xlu0 %v814_v58, %s1433_s20 }
0x12e6   :  { %v817_v60 = vpop.permute.xlu0 %816 }
0x12e7   :  { %v819_v61 = vadd.f32 %v817_v60, %v809_v59 }
0x12e9   :  { %1353 = vtanh.f32 %v819_v61 }
0x12f6   :  { %v1354_v62 = vpop.eup %1353 }
0x12f7   :  { %822 = vrot.lane.b32.xlu1 %v1354_v62, %s1432_s0 }
0x1369   :  { %v823_v63 = vpop.permute.xlu1 %822 }
0x136a   :  { %v825_v1 = vmul.f32 %v823_v63, %v806_v54 }
0x136c   :  { %827 = vrot.lane.b32.xlu0 %v825_v1, %s1433_s20 }
0x13de   :  { %v828_v2 = vpop.permute.xlu0 %827 }
0x13df   :  { %830 = vst.msk [vmem:[#allocation2 + $0x30] sm:$0xff] %vm199_vm2, %v828_v2  ;;  %1282 = vmatmul.mubr.msk.f32.vlgmr.msra.gmra.mxu0 %vm199_vm2, %v828_v2 }
0x13e6   :  { %v942_v3 = vld [vmem:[#allocation2 + $0x30] sm:$0xff] }
0x13e7   :  { %1301 = vmatprep.mubr.msk.f32.mxu1 %vm199_vm2, %v942_v3 }
0x149f   :  { %v899_v30 = vpop.f32.mrf.mxu0 }
0x14a0   :  { %v900_v4 = vadd.f32 %v1505_v10, %v899_v30 }
0x14a1   :  { %v1283_v5 = vpop.f32.mrf.mxu0 }
0x14a2   :  { %v903_v6 = vpack.c.bf16 %v900_v4, %v900_v4 }
0x14a4   :  { %v1121_v7 = vmul.bf16 3216621497, %v903_v6 }
0x14a6   :  { %1355 = vpow.bf16 %v1121_v7 }
0x14b4   :  { %v1356_v31 = vpop.eup %1355 }
0x14b5   :  { %v908_v8 = vadd.bf16 1065369472, %v1356_v31 }
0x14b7   :  { %1357 = vrcp.bf16 %v908_v8 }
0x14c5   :  { %v1358_v9 = vpop.eup %1357 }
0x14c6   :  { %v910_v11 = vmul.bf16 1065369472, %v1358_v9 }
0x14c8   :  { %v911_v0 = vunpack.c.l.bf16 %v910_v11 }
0x14ca   :  { %v912_v32 = vmul.f32 2.0, %v911_v0  ;;  %v914_v14 = vmul.f32 %v911_v0, %v819_v61 }
0x14cc   :  { %v1122_v33 = vadd.f32 -1.0, %v912_v32 }
0x14ce   :  { %916 = vrot.lane.b32.xlu1 %v1122_v33, %s1432_s0 }
0x1540   :  { %v917_v12 = vpop.permute.xlu1 %916 }
0x1541   :  { %v919_v13 = vmul.f32 %v917_v12, %v911_v0 }
0x1543   :  { %921 = vrot.lane.b32.xlu0 %v919_v13, %s1433_s20 }
0x15b5   :  { %v922_v10 = vpop.permute.xlu0 %921 }
0x15b6   :  { %v924_v15 = vadd.f32 %v922_v10, %v914_v14 }
0x15b8   :  { %1359 = vtanh.f32 %v924_v15 }
0x15c5   :  { %v1360_v16 = vpop.eup %1359 }
0x15c6   :  { %927 = vrot.lane.b32.xlu1 %v1360_v16, %s1432_s0 }
0x1638   :  { %v928_v17 = vpop.permute.xlu1 %927 }
0x1639   :  { %v930_v18 = vmul.f32 %v928_v17, %v911_v0 }
0x163b   :  { %932 = vrot.lane.b32.xlu0 %v930_v18, %s1433_s20 }
0x16ad   :  { %v933_v19 = vpop.permute.xlu0 %932 }
0x16ae   :  { %935 = vst.msk [vmem:[#allocation2 + $0x38] sm:$0xff] %vm199_vm2, %v933_v19 }
0x16b5   :  { %v943_v20 = vld [vmem:[#allocation2 + $0x38] sm:$0xff] }
0x16b6   :  { %1302 = vmatmul.mubr.msk.f32.gmra.mxu1 %vm199_vm2, %v943_v20 }
0x1776   :  { %v1303_v21 = vpop.f32.mrf.mxu1 }
0x1777   :  { %v1081_v22 = vadd.f32 %v1303_v21, %v1638_v37 }
0x1778   :  { %v1075_v23 = vpop.f32.mrf.mxu1 }
0x1779   :  { %1091 = vst [vmem:[%s1694_s7 + $0x38] sm:$0xff] %v1081_v22  ;;  %v1076_v24 = vadd.f32 %v1638_v37, %v1075_v23 }
0x177b   :  { %1090 = vst [vmem:[%s1694_s7 + $0x30] sm:$0xff] %v1076_v24 }
0x177c   :  { %1096 = vsyncpa [#allocation4], 1 }
0x177d   :  { %1097 = vsyncpa [#allocation6], 1 }

</bundles_post_ra>
